<compile_context>
chip_gen: v5e
topology: v5e:2x2
jax: 0.10.0
libtpu: 0.0.40
codegen_flags: <defaults>
</compile_context>

<pallas_src>
import math

import jax
import jax.numpy as jnp
from jax.experimental import pallas as pl
from jax.experimental.pallas import tpu as pltpu

_TORCH_PI = 3.1415926536
_C1 = math.sqrt(2.0 / _TORCH_PI)      # sqrt(2/pi)
_C3 = _C1 * 0.044715                  # folded cubic coefficient

_LANES = 128
_SUBLANES = 8


def _gelu_kernel(x_ref, o_ref):
    # f32 compute regardless of I/O dtype (accuracy for bf16/f16 streams).
    x = x_ref[...].astype(jnp.float32)
    x2 = x * x
    inner = x * (_C1 + _C3 * x2)      # == sqrt(2/pi) * (x + 0.044715 * x^3)
    hx = 0.5 * x
    o_ref[...] = (hx + hx * jnp.tanh(inner)).astype(o_ref.dtype)


def _default_block_bytes():
    """~2 MiB blocks on v5e-class chips, ~4 MiB on v6e/v7x."""
    try:
        kind = jax.devices()[0].device_kind.lower()
    except Exception:
        return 2 * 1024 * 1024
    if "v5 lite" in kind or "v5e" in kind or "v5lite" in kind:
        return 2 * 1024 * 1024
    return 4 * 1024 * 1024


def my_gelu(x, *, max_block_bytes=None):
    """Tanh-approx GELU, elementwise, any shape / float dtype."""
    orig_shape = x.shape
    n = x.size
    if n == 0:
        return x
    if max_block_bytes is None:
        max_block_bytes = _default_block_bytes()
    itemsize = jnp.dtype(x.dtype).itemsize

    # ---- Layout-preserving view: no relayout copies, no padding. ----
    if x.ndim == 0:
        arr = x.reshape(1, 1)
    elif x.ndim == 1:
        arr = x.reshape(1, n)                        # add a leading unit dim
    elif x.ndim == 2:
        arr = x                                      # tile directly
    else:
        # Collapse *leading* dims only; the minor two (tiled) dims are
        # untouched, so this is a bitcast on TPU's tiled layout.
        arr = x.reshape(-1, x.shape[-2], x.shape[-1])

    shape = arr.shape
    ndim = arr.ndim

    # ---- Choose the (single) grid axis and its alignment multiple. ----
    if ndim == 3:
        slab_bytes = shape[1] * shape[2] * itemsize
        if slab_bytes <= max_block_bytes:
            axis, multiple = 0, 1                    # block whole (S, W) slabs
        else:
            axis, multiple = 1, _SUBLANES            # huge slab: block its rows
    else:  # 2-D
        rows, cols = shape
        row_bytes = cols * itemsize
        if rows >= 2 * _SUBLANES and row_bytes <= max_block_bytes:
            axis, multiple = 0, _SUBLANES
        elif cols >= _LANES:
            axis, multiple = 1, _LANES
        else:
            axis, multiple = 0, _SUBLANES
    # NOTE: extreme shapes whose trailing-dims slab alone exceeds VMEM are not
    # further split; not reachable for this module's MLP-activation use case.

    dim = shape[axis]
    unit_bytes = max(1, (arr.size // dim) * itemsize)   # bytes per unit slice
    block = max(1, max_block_bytes // unit_bytes)
    if multiple > 1:
        block = max(multiple, (block // multiple) * multiple)
    block = min(dim, block)

    grid = pl.cdiv(dim, block)
    # Even grid when split: balances v7x's 2 TensorCores (no-op on 1-TC chips).
    if grid > 1 and grid % 2 == 1:
        cand = pl.cdiv(pl.cdiv(dim, grid + 1), multiple) * multiple
        cand = min(dim, max(multiple, cand))
        if pl.cdiv(dim, cand) % 2 == 0:
            block = cand
            grid = pl.cdiv(dim, block)

    block_shape = tuple(block if d == axis else s for d, s in enumerate(shape))

    def index_map(i, _axis=axis, _nd=ndim):
        return tuple(i if d == _axis else 0 for d in range(_nd))

    cost = pl.CostEstimate(
        flops=8 * n,
        transcendentals=n,
        bytes_accessed=2 * n * itemsize,
    )

    out = pl.pallas_call(
        _gelu_kernel,
        out_shape=jax.ShapeDtypeStruct(shape, x.dtype),
        grid_spec=pltpu.PrefetchScalarGridSpec(
            num_scalar_prefetch=0,
            grid=(grid,),
            in_specs=[pl.BlockSpec(block_shape, index_map)],
            out_specs=pl.BlockSpec(block_shape, index_map),
        ),
        compiler_params=pltpu.CompilerParams(
            dimension_semantics=("parallel",),
            vmem_limit_bytes=32 * 1024 * 1024,
        ),
        cost_estimate=cost,
    )(arr)

    return out.reshape(orig_shape)


def my_gelu_ref(x):
    return 0.5 * x * (1.0 + jnp.tanh(_C1 * (x + 0.044715 * jnp.power(x, 3))))


if __name__ == "__main__":
    key = jax.random.PRNGKey(0)
    k1, k2, k3, k4 = jax.random.split(key, 4)

    # Small NCHW-like activation tensor consistent with typical module usage.
    x = jax.random.normal(k1, (2, 4, 16, 16), dtype=jnp.float32)
    out = jax.block_until_ready(my_gelu(x))
    ref = my_gelu_ref(x)
    assert out.shape == x.shape and out.dtype == x.dtype
    assert jnp.allclose(out, ref, atol=1e-5, rtol=1e-5), "mismatch vs reference"

    # (batch, hidden) MLP-activation shape: 2-D path, zero reshapes.
    x2 = jax.random.normal(k2, (8, 32), dtype=jnp.float32)
    assert jnp.allclose(jax.block_until_ready(my_gelu(x2)), my_gelu_ref(x2),
                        atol=1e-5, rtol=1e-5)

    # Irregular shape: full-extent trailing dims (exempt), no padding copy.
    x3 = jax.random.normal(k3, (3, 5, 7), dtype=jnp.float32)
    assert jnp.allclose(jax.block_until_ready(my_gelu(x3)), my_gelu_ref(x3),
                        atol=1e-5, rtol=1e-5)

    # 1-D input whose size is not a multiple of 128.
    x4 = jax.random.normal(k4, (1000,), dtype=jnp.float32)
    assert jnp.allclose(jax.block_until_ready(my_gelu(x4)), my_gelu_ref(x4),
                        atol=1e-5, rtol=1e-5)

    # bf16 I/O (f32 compute inside the kernel).
    xb = jax.random.normal(k1, (2, 4, 16, 16), dtype=jnp.bfloat16)
    outb = jax.block_until_ready(my_gelu(xb))
    refb = my_gelu_ref(xb.astype(jnp.float32)).astype(jnp.bfloat16)
    assert outb.dtype == jnp.bfloat16
    assert jnp.allclose(outb.astype(jnp.float32), refb.astype(jnp.float32),
                        atol=2e-2, rtol=2e-2)

    print("KERNEL_OK")
</pallas_src>

<mosaic_0001>
module attributes {stable_mosaic.version = 11 : i64} {
  func.func @_gelu_kernel(%arg0: i32, %arg1: memref<8x16x16xf32, #tpu.memory_space<vmem>>, %arg2: memref<8x16x16xf32, #tpu.memory_space<vmem>>) attributes {dimension_semantics = [#tpu.dimension_semantics<parallel>], iteration_bounds = array<i64: 1>, scalar_prefetch = 0 : i64, scratch_operands = 0 : i64, tpu.core_type = #tpu.core_type<tc>, window_params = [{transform_indices = @transform_0, window_bounds = array<i64: 8, 16, 16>}, {transform_indices = @transform_1, window_bounds = array<i64: 8, 16, 16>}]} {
    %c0 = arith.constant 0 : index
    %c0_0 = arith.constant 0 : index
    %c0_1 = arith.constant 0 : index
    %0 = vector.load %arg1[%c0, %c0_0, %c0_1] : memref<8x16x16xf32, #tpu.memory_space<vmem>>, vector<8x16x16xf32>
    %1 = arith.mulf %0, %0 : vector<8x16x16xf32>
    %cst = arith.constant 0.0356774069 : f32
    %2 = vector.broadcast %cst : f32 to vector<8x16x16xf32>
    %3 = arith.mulf %2, %1 : vector<8x16x16xf32>
    %cst_2 = arith.constant 0.797884583 : f32
    %4 = vector.broadcast %cst_2 : f32 to vector<8x16x16xf32>
    %5 = arith.addf %4, %3 : vector<8x16x16xf32>
    %6 = arith.mulf %0, %5 : vector<8x16x16xf32>
    %cst_3 = arith.constant 5.000000e-01 : f32
    %7 = vector.broadcast %cst_3 : f32 to vector<8x16x16xf32>
    %8 = arith.mulf %7, %0 : vector<8x16x16xf32>
    %9 = math.tanh %6 : vector<8x16x16xf32>
    %10 = arith.mulf %8, %9 : vector<8x16x16xf32>
    %11 = arith.addf %8, %10 : vector<8x16x16xf32>
    %c0_4 = arith.constant 0 : index
    %c0_5 = arith.constant 0 : index
    %c0_6 = arith.constant 0 : index
    %12 = vector.load %arg2[%c0_4, %c0_5, %c0_6] : memref<8x16x16xf32, #tpu.memory_space<vmem>>, vector<8x16x16xf32>
    tpu.vector_store %arg2[%c0_4, %c0_5, %c0_6], %11 {strides = array<i32>} : memref<8x16x16xf32, #tpu.memory_space<vmem>>, vector<8x16x16xf32>,
    return
  }
  func.func @transform_0(%arg0: i32) -> (i32, i32, i32) {
    %c0_i32 = arith.constant 0 : i32
    %c0_i32_0 = arith.constant 0 : i32
    %c0_i32_1 = arith.constant 0 : i32
    return %arg0, %c0_i32, %c0_i32_0 : i32, i32, i32
  }
  func.func @transform_1(%arg0: i32) -> (i32, i32, i32) {
    %c0_i32 = arith.constant 0 : i32
    %c0_i32_0 = arith.constant 0 : i32
    %c0_i32_1 = arith.constant 0 : i32
    return %arg0, %c0_i32, %c0_i32_0 : i32, i32, i32
  }
}

</mosaic_0001>

<bundles_post_ra>
// kernel: tpu_custom_call.1
= control target key start
LH: loop header
LB: loop body
LE: loop exit
PB: predicated region body
PF: predicated region fallthrough
CT: control target
= control target key end

     0   :  { %6 = vsyncpa [#allocation3], 0  ;;  %s395_s0 = inlined_call_operand.hbm [shape: f32[8,16,16], index: 0, kind: input, shape index: {}]   ;;  %s396_s1 = inlined_call_operand.hbm [shape: f32[8,16,16], index: 1, kind: output, shape index: {}]  }
   0x1   :  { %7 = vsyncpa [#allocation4], 0  ;;  %s12_s8 = sshll.u32 %s395_s0, 4  ;;  %s293_s9 = smov [#allocation2]   ;;  %s13_s8 = int_to_ptr.hbm [resolvable:$true] %s12_s8 }
   0x2   :  { %s14_s10 = sshll.u32 %s293_s9, 4  ;;  %s294_s11 = smov 128   ;;  %s15_s10 = int_to_ptr.vmem [resolvable:$true] %s14_s10 }
   0x3   :  { %s295_s12 = smov 8  }
   0x4   :  { %20 = dma.hbm_to_vmem [thread:$0]  %s13_s8, 2048, %s15_s10, [#allocation3], %s294_s11, %s294_s11, %s295_s12  }
   0x5   :  { %289 = dma.done.wait [#allocation3], 2048  }
   0x6   :  { %290 = vsyncadd [#allocation3], 4294965248  ;;  %v25_v0 = vld [vmem:[#allocation2] sm:$0xff]  ;;  %v26_v1 = vld [vmem:[#allocation2 + $0x8] sm:$0xff]  ;;  %vm169_vm0 = vcmask 130048   ;;  %s296_s0 = smov [#allocation5]  }
   0x7   :  { %v27_v2 = vld [vmem:[#allocation2 + $0x10] sm:$0xff]  ;;  %v41_v3 = vmul.f32 %v25_v0, %v25_v0  ;;  %v42_v4 = vmul.f32 %v26_v1, %v26_v1  ;;  %v28_v5 = vld [vmem:[#allocation2 + $0x18] sm:$0xff]  ;;  %v29_v6 = vld [vmem:[#allocation2 + $0x20] sm:$0xff]  ;;  %v313_v8 = vmul.f32 0.5, %v25_v0  ;;  %v315_v14 = vmul.f32 0.5, %v26_v1  ;;  %s190_s13 = sshll.u32 %s296_s0, 4  ;;  %s191_s13 = int_to_ptr.vmem [resolvable:$true] %s190_s13 }
   0x8   :  { %v30_v7 = vld [vmem:[#allocation2 + $0x28] sm:$0xff]  ;;  %v43_v9 = vmul.f32 %v27_v2, %v27_v2  ;;  %v44_v10 = vmul.f32 %v28_v5, %v28_v5  ;;  %v31_v11 = vld [vmem:[#allocation2 + $0x30] sm:$0xff]  ;;  %v45_v15 = vmul.f32 %v29_v6, %v29_v6  ;;  %v32_v16 = vld [vmem:[#allocation2 + $0x38] sm:$0xff]  ;;  %v317_v18 = vmul.f32 0.5, %v27_v2  ;;  %s192_s16 = sshll.u32 %s396_s1, 4  ;;  %s193_s16 = int_to_ptr.hbm [resolvable:$true] %s192_s16 }
   0x9   :  { %v57_v12 = vmul.f32 0.035677407, %v41_v3  ;;  %v58_v13 = vmul.f32 0.035677407, %v42_v4  ;;  %v46_v20 = vmul.f32 %v30_v7, %v30_v7  ;;  %v47_v24 = vmul.f32 %v31_v11, %v31_v11  ;;  %v33_v33 = vld [vmem:[#allocation2 + $0x40] sm:$0xff]  ;;  %v321_v41 = vld [vmem:[#allocation2 + $0x48] sm:$0xff] }
   0xa   :  { %v59_v17 = vmul.f32 0.035677407, %v43_v9  ;;  %v60_v19 = vmul.f32 0.035677407, %v44_v10  ;;  %v61_v23 = vmul.f32 0.035677407, %v45_v15  ;;  %v48_v28 = vmul.f32 %v32_v16, %v32_v16 }
   0xb   :  { %v73_v21 = vadd.f32 0.7978846, %v57_v12  ;;  %v74_v22 = vadd.f32 0.7978846, %v58_v13  ;;  %v62_v27 = vmul.f32 0.035677407, %v46_v20  ;;  %v49_v44 = vmul.f32 %v33_v33, %v33_v33 }
   0xc   :  { %v75_v25 = vadd.f32 0.7978846, %v59_v17  ;;  %v76_v26 = vadd.f32 0.7978846, %v60_v19  ;;  %v77_v31 = vadd.f32 0.7978846, %v61_v23  ;;  %v50_v52 = vmul.f32 %v321_v41, %v321_v41 }
   0xd   :  { %v89_v29 = vmul.f32 %v73_v21, %v25_v0  ;;  %v90_v30 = vmul.f32 %v74_v22, %v26_v1  ;;  %v63_v32 = vmul.f32 0.035677407, %v47_v24  ;;  %v319_v36 = vmul.f32 0.5, %v28_v5  ;;  %v325_v45 = vld [vmem:[#allocation2 + $0x50] sm:$0xff]  ;;  %v329_v49 = vld [vmem:[#allocation2 + $0x58] sm:$0xff]  ;;  %v335_v53 = vld [vmem:[#allocation2 + $0x60] sm:$0xff] }
   0xe   :  { %v91_v34 = vmul.f32 %v75_v25, %v27_v2  ;;  %v92_v35 = vmul.f32 %v76_v26, %v28_v5  ;;  %v78_v37 = vadd.f32 0.7978846, %v62_v27  ;;  %v93_v38 = vmul.f32 %v77_v31, %v29_v6  ;;  %v38_v24 = vld [vmem:[#allocation2 + $0x68] sm:$0xff] }
   0xf   :  { %209 = vtanh.f32 %v89_v29  ;;  %v79_v39 = vadd.f32 0.7978846, %v63_v32  ;;  %v64_v40 = vmul.f32 0.035677407, %v48_v28  ;;  %v323_v42 = vmul.f32 0.5, %v29_v6  ;;  %v39_v28 = vld [vmem:[#allocation2 + $0x70] sm:$0xff] }
  0x10   :  { %211 = vtanh.f32 %v90_v30  ;;  %v94_v43 = vmul.f32 %v78_v37, %v30_v7  ;;  %v327_v46 = vmul.f32 0.5, %v30_v7  ;;  %v331_v50 = vmul.f32 0.5, %v31_v11 }
  0x11   :  { %213 = vtanh.f32 %v91_v34  ;;  %v95_v47 = vmul.f32 %v79_v39, %v31_v11  ;;  %v80_v48 = vadd.f32 0.7978846, %v64_v40  ;;  %v65_v51 = vmul.f32 0.035677407, %v49_v44 }
  0x12   :  { %215 = vtanh.f32 %v92_v35  ;;  %v337_v55 = vmul.f32 0.5, %v32_v16  ;;  %v51_v56 = vmul.f32 %v325_v45, %v325_v45  ;;  %v66_v58 = vmul.f32 0.035677407, %v50_v52 }
  0x13   :  { %217 = vtanh.f32 %v93_v38  ;;  %v96_v54 = vmul.f32 %v80_v48, %v32_v16  ;;  %v81_v57 = vadd.f32 0.7978846, %v65_v51  ;;  %v52_v59 = vmul.f32 %v329_v49, %v329_v49 }
  0x14   :  { %219 = vtanh.f32 %v94_v43  ;;  %v343_v61 = vmul.f32 0.5, %v33_v33  ;;  %v67_v62 = vmul.f32 0.035677407, %v51_v56  ;;  %v53_v63 = vmul.f32 %v335_v53, %v335_v53 }
  0x15   :  { %v210_v60 = vpop.eup %209  ;;  %221 = vtanh.f32 %v95_v47  ;;  %v97_v2 = vmul.f32 %v81_v57, %v33_v33  ;;  %v82_v3 = vadd.f32 0.7978846, %v66_v58  ;;  %v68_v7 = vmul.f32 0.035677407, %v52_v59 }
  0x16   :  { %v212_v0 = vpop.eup %211  ;;  %v137_v1 = vmul.f32 %v210_v60, %v313_v8  ;;  %223 = vtanh.f32 %v96_v54  ;;  %v83_v6 = vadd.f32 0.7978846, %v67_v62  ;;  %v69_v9 = vmul.f32 0.035677407, %v53_v63 }
  0x17   :  { %v214_v4 = vpop.eup %213  ;;  %v138_v5 = vmul.f32 %v212_v0, %v315_v14  ;;  %225 = vtanh.f32 %v97_v2  ;;  %v98_v13 = vmul.f32 %v82_v3, %v321_v41  ;;  %v84_v20 = vadd.f32 0.7978846, %v68_v7 }
  0x18   :  { %v216_v10 = vpop.eup %215  ;;  %v153_v11 = vadd.f32 %v137_v1, %v313_v8  ;;  %v139_v12 = vmul.f32 %v214_v4, %v317_v18  ;;  %v99_v19 = vmul.f32 %v83_v6, %v325_v45  ;;  %v85_v23 = vadd.f32 0.7978846, %v69_v9 }
  0x19   :  { %v218_v15 = vpop.eup %217  ;;  %v154_v16 = vadd.f32 %v138_v5, %v315_v14  ;;  %v140_v17 = vmul.f32 %v216_v10, %v319_v36  ;;  %227 = vtanh.f32 %v98_v13  ;;  %v100_v27 = vmul.f32 %v84_v20, %v329_v49 }
  0x1a   :  { %v220_v21 = vpop.eup %219  ;;  %170 = vst.msk [vmem:[#allocation5] sm:$0xff] %vm169_vm0, %v153_v11  ;;  %v155_v22 = vadd.f32 %v139_v12, %v317_v18  ;;  %v141_v8 = vmul.f32 %v218_v15, %v323_v42  ;;  %229 = vtanh.f32 %v99_v19  ;;  %v114_v31 = vmul.f32 0.5, %v321_v41 }
  0x1b   :  { %v222_v25 = vpop.eup %221  ;;  %171 = vst.msk [vmem:[#allocation5 + $0x8] sm:$0xff] %vm169_vm0, %v154_v16  ;;  %v156_v14 = vadd.f32 %v140_v17, %v319_v36  ;;  %v142_v26 = vmul.f32 %v220_v21, %v327_v46  ;;  %v101_v32 = vmul.f32 %v85_v23, %v335_v53  ;;  %231 = vtanh.f32 %v100_v27  ;;  %v40_v36 = vld [vmem:[#allocation2 + $0x78] sm:$0xff] }
  0x1c   :  { %v224_v29 = vpop.eup %223  ;;  %172 = vst.msk [vmem:[#allocation5 + $0x10] sm:$0xff] %vm169_vm0, %v155_v22  ;;  %v157_v18 = vadd.f32 %v141_v8, %v323_v42  ;;  %v143_v30 = vmul.f32 %v222_v25, %v331_v50  ;;  %v54_v35 = vmul.f32 %v38_v24, %v38_v24  ;;  %v115_v39 = vmul.f32 0.5, %v325_v45 }
  0x1d   :  { %173 = vst.msk [vmem:[#allocation5 + $0x18] sm:$0xff] %vm169_vm0, %v156_v14  ;;  %v158_v33 = vadd.f32 %v142_v26, %v327_v46  ;;  %v144_v34 = vmul.f32 %v224_v29, %v337_v55  ;;  %v226_v37 = vpop.eup %225  ;;  %233 = vtanh.f32 %v101_v32  ;;  %v55_v40 = vmul.f32 %v39_v28, %v39_v28 }
  0x1e   :  { %174 = vst.msk [vmem:[#allocation5 + $0x20] sm:$0xff] %vm169_vm0, %v157_v18  ;;  %v159_v38 = vadd.f32 %v143_v30, %v331_v50  ;;  %v145_v42 = vmul.f32 %v226_v37, %v343_v61  ;;  %v70_v43 = vmul.f32 0.035677407, %v54_v35  ;;  %v116_v46 = vmul.f32 0.5, %v329_v49 }
  0x1f   :  { %175 = vst.msk [vmem:[#allocation5 + $0x28] sm:$0xff] %vm169_vm0, %v158_v33  ;;  %v160_v41 = vadd.f32 %v144_v34, %v337_v55  ;;  %v228_v44 = vpop.eup %227  ;;  %v71_v47 = vmul.f32 0.035677407, %v55_v40  ;;  %v56_v48 = vmul.f32 %v40_v36, %v40_v36  ;;  %v117_v52 = vmul.f32 0.5, %v335_v53 }
  0x20   :  { %176 = vst.msk [vmem:[#allocation5 + $0x30] sm:$0xff] %vm169_vm0, %v159_v38  ;;  %v230_v51 = vpop.eup %229  ;;  %v161_v45 = vadd.f32 %v145_v42, %v343_v61  ;;  %v146_v50 = vmul.f32 %v228_v44, %v114_v31  ;;  %v86_v54 = vadd.f32 0.7978846, %v70_v43  ;;  %v118_v4 = vmul.f32 0.5, %v38_v24 }
  0x21   :  { %177 = vst.msk [vmem:[#allocation5 + $0x38] sm:$0xff] %vm169_vm0, %v160_v41  ;;  %v147_v55 = vmul.f32 %v230_v51, %v115_v39  ;;  %v87_v56 = vadd.f32 0.7978846, %v71_v47  ;;  %v72_v57 = vmul.f32 0.035677407, %v56_v48  ;;  %v232_v58 = vpop.eup %231  ;;  %v119_v5 = vmul.f32 0.5, %v39_v28 }
  0x22   :  { %178 = vst.msk [vmem:[#allocation5 + $0x40] sm:$0xff] %vm169_vm0, %v161_v45  ;;  %v162_v59 = vadd.f32 %v146_v50, %v114_v31  ;;  %v102_v60 = vmul.f32 %v86_v54, %v38_v24  ;;  %v148_v63 = vmul.f32 %v232_v58, %v116_v46  ;;  %v120_v7 = vmul.f32 0.5, %v40_v36 }
  0x23   :  { %v234_v49 = vpop.eup %233  ;;  %v163_v62 = vadd.f32 %v147_v55, %v115_v39  ;;  %v103_v0 = vmul.f32 %v87_v56, %v39_v28  ;;  %v88_v1 = vadd.f32 0.7978846, %v72_v57 }
  0x24   :  { %179 = vst.msk [vmem:[#allocation5 + $0x48] sm:$0xff] %vm169_vm0, %v162_v59  ;;  %v149_v61 = vmul.f32 %v234_v49, %v117_v52  ;;  %235 = vtanh.f32 %v102_v60  ;;  %v164_v53 = vadd.f32 %v148_v63, %v116_v46 }
  0x25   :  { %180 = vst.msk [vmem:[#allocation5 + $0x50] sm:$0xff] %vm169_vm0, %v163_v62  ;;  %237 = vtanh.f32 %v103_v0  ;;  %v104_v2 = vmul.f32 %v88_v1, %v40_v36 }
  0x26   :  { %v165_v3 = vadd.f32 %v149_v61, %v117_v52  ;;  %181 = vst.msk [vmem:[#allocation5 + $0x58] sm:$0xff] %vm169_vm0, %v164_v53 }
  0x27   :  { %239 = vtanh.f32 %v104_v2 }
  0x28   :  { %182 = vst.msk [vmem:[#allocation5 + $0x60] sm:$0xff] %vm169_vm0, %v165_v3 }
  0x2a   :  { %v236_v6 = vpop.eup %235 }
  0x2b   :  { %v238_v9 = vpop.eup %237  ;;  %v150_v10 = vmul.f32 %v236_v6, %v118_v4 }
  0x2c   :  { %v151_v11 = vmul.f32 %v238_v9, %v119_v5 }
  0x2d   :  { %v240_v12 = vpop.eup %239  ;;  %v166_v13 = vadd.f32 %v150_v10, %v118_v4 }
  0x2e   :  { %v167_v15 = vadd.f32 %v151_v11, %v119_v5  ;;  %v152_v16 = vmul.f32 %v240_v12, %v120_v7 }
  0x2f   :  { %183 = vst.msk [vmem:[#allocation5 + $0x68] sm:$0xff] %vm169_vm0, %v166_v13 }
  0x30   :  { %184 = vst.msk [vmem:[#allocation5 + $0x70] sm:$0xff] %vm169_vm0, %v167_v15  ;;  %v168_v17 = vadd.f32 %v152_v16, %v120_v7 }
  0x32   :  { %185 = vst.msk [vmem:[#allocation5 + $0x78] sm:$0xff] %vm169_vm0, %v168_v17 }
  0x33   :  { %198 = dma.vmem_to_hbm [thread:$0]  %s191_s13, 2048, %s193_s16, [#allocation4], %s294_s11, %s294_s11, %s295_s12  }
  0x34   :  { %291 = dma.done.wait [#allocation4], 2048  }
  0x35   :  { %292 = vsyncadd [#allocation4], 4294965248 }
  0x36   :  { %203 = vsyncpa [#allocation3], 1 }
  0x37   :  { %204 = vsyncpa [#allocation4], 1 }

</bundles_post_ra>
